<compile_context>
chip_gen: v7x
topology: tpu7x:2x2x1
jax: 0.10.0
libtpu: 0.0.40
codegen_flags: <defaults>
</compile_context>

<pallas_src>
import functools

import jax
import jax.numpy as jnp
from jax.experimental import pallas as pl
from jax.experimental.pallas import tpu as pltpu


# ---------------------------------------------------------------------------
# One-time hardware probe (import time; never wraps kernel execution).
# ---------------------------------------------------------------------------
def _vmem_capacity_bytes():
    try:
        info = pltpu.get_tpu_info()
        cap = int(getattr(info, "vmem_capacity_bytes", 0))
        if cap > 0:
            return cap
    except Exception:  # hardware query only -- fall back to the smallest gen
        pass
    return 64 * 1024 * 1024  # v7x per-TC VMEM (smallest across v5e/v6e/v7x)


_VMEM_CAPACITY = _vmem_capacity_bytes()
_VMEM_HEADROOM = 12 * 1024 * 1024            # semaphores / internal scratch / slack
_VMEM_BUDGET = max(16 * 1024 * 1024, _VMEM_CAPACITY - _VMEM_HEADROOM)
_SCOPED_VMEM_DEFAULT = 12 * 1024 * 1024      # only raise vmem_limit above this


# ---------------------------------------------------------------------------
# Kernel
# ---------------------------------------------------------------------------
def _gan_block_kernel(x_ref, w1_ref, b1_ref, w2_ref, b2_ref, o_ref, acc_ref):
    """One (batch-tile, hidden-chunk) grid step of relu(x@W1 + b1) @ W2 + b2.

    Grid axis 0 tiles the batch ("parallel"); axis 1 streams chunks of the
    hidden dimension ("arbitrary" reduction).  For each chunk k:
        h_k  = relu(x @ W1[:, k] + b1[k])     # (tile_b, tk)
        acc += h_k @ W2[k, :]                 # (tile_b, D)
    b2 is added and the result stored on the last chunk.  With a single chunk
    (weights fully resident) this is the plain fused two-layer MLP.
    """
    k = pl.program_id(1)

    @pl.when(k == 0)
    def _():
        acc_ref[...] = jnp.zeros_like(acc_ref)

    # Layer 1: bf16 MXU operands, f32 accumulation; bias + ReLU in f32 (VPU).
    h = jnp.dot(
        x_ref[...].astype(jnp.bfloat16),
        w1_ref[...],
        preferred_element_type=jnp.float32,
    )
    h = jnp.maximum(h + b1_ref[...], 0.0)

    # Layer 2 partial product, accumulated over hidden chunks.
    acc_ref[...] += jnp.dot(
        h.astype(jnp.bfloat16),
        w2_ref[...],
        preferred_element_type=jnp.float32,
    )

    @pl.when(k == pl.num_programs(1) - 1)
    def _():
        o_ref[...] = (acc_ref[...] + b2_ref[...]).astype(o_ref.dtype)


# ---------------------------------------------------------------------------
# Tiling / VMEM sizing helpers
# ---------------------------------------------------------------------------
def _round_up(n, m):
    return ((n + m - 1) // m) * m


def _cdiv(a, b):
    return -(-a // b)


def _pad2(a, rows, cols):
    r, c = a.shape
    if (r, c) == (rows, cols):
        return a
    return jnp.pad(a, ((0, rows - r), (0, cols - c)))


def _choose_batch_tiling(B, max_tile_b):
    """Tile the batch with (almost) no padding and a balanced tile count.

    Picks a tile size that divides the 8-rounded batch (instead of padding the
    batch up to a fixed tile), and prefers an even number of tiles >= 2 so the
    "parallel" batch axis splits evenly across v7x's two TensorCores and the
    x/out DMAs have >=2 steps to pipeline against.
    """
    b8 = _round_up(max(B, 1), 8)
    num = _cdiv(b8, max_tile_b)
    if b8 >= 128:                      # big enough that >=2 tiles are useful
        num = max(num, 2)
    if num > 1 and num % 2:            # even count -> balanced on 2 TCs (v7x)
        num += 1
    tile_b = _round_up(_cdiv(b8, num), 8)
    b_pad = num * tile_b
    return b_pad, tile_b, num


def _vmem_estimate(tile_b, d_pad, tk, out_bytes):
    weights = 2 * 2 * (d_pad * tk) * 2          # W1/W2 chunks, bf16, double-buffered
    biases = 2 * (tk + d_pad) * 4
    x_io = 2 * tile_b * d_pad * 4               # x tile double buffer (<= f32)
    o_io = 2 * tile_b * d_pad * out_bytes       # out tile double buffer
    acc = tile_b * d_pad * 4                    # f32 accumulator scratch
    temps = tile_b * tk * (4 + 2) + tile_b * d_pad * (4 + 2)  # h / bf16 copies / y
    return weights + biases + x_io + o_io + acc + temps


# ---------------------------------------------------------------------------
# Builder: one compiled function per (B, D, dtype), cached.
# ---------------------------------------------------------------------------
@functools.lru_cache(maxsize=None)
def _build_gan_block(B, D, dtype_name):
    out_dtype = jnp.dtype(dtype_name)
    out_bytes = out_dtype.itemsize

    d_pad = _round_up(D, 128)                   # lane-dense loads/stores

    # Batch tile: bigger on the 128-MiB-VMEM chips (v5e/v6e), smaller on v7x;
    # also capped by the per-tile activation working set.
    gen_ceiling = 1024 if _VMEM_CAPACITY >= 96 * 1024 * 1024 else 512
    act_row = d_pad * (2 * 4 + 2 * out_bytes + 4 + 4 + 2 + 6)
    max_tile_act = max(8, ((_VMEM_BUDGET // 2) // act_row) // 8 * 8)
    b_pad, tile_b, num_b = _choose_batch_tiling(B, min(gen_ceiling, max_tile_act))

    # Hidden-dim chunking: keep full (D,D) bf16 weights resident when they fit
    # the VMEM budget, otherwise stream 128-multiple chunks (large-D on v7x).
    tk = d_pad
    while tk > 128 and _vmem_estimate(tile_b, d_pad, tk, out_bytes) > _VMEM_BUDGET:
        tk = _round_up(tk // 2, 128)
    num_k = _cdiv(d_pad, tk)
    h_pad = num_k * tk                          # padded hidden dim (chunk multiple)

    grid = (b_pad // tile_b, num_k)

    in_specs = [
        pl.BlockSpec((tile_b, d_pad), lambda i, k: (i, 0)),   # x tile
        pl.BlockSpec((d_pad, tk), lambda i, k: (0, k)),       # W1^T chunk (bf16)
        pl.BlockSpec((1, tk), lambda i, k: (0, k)),           # b1 chunk (f32)
        pl.BlockSpec((tk, d_pad), lambda i, k: (k, 0)),       # W2^T chunk (bf16)
        pl.BlockSpec((1, d_pad), lambda i, k: (0, 0)),        # b2 (f32, resident)
    ]
    out_specs = pl.BlockSpec((tile_b, d_pad), lambda i, k: (i, 0))

    compiler_kwargs = {"dimension_semantics": ("parallel", "arbitrary")}
    vmem_est = _vmem_estimate(tile_b, d_pad, tk, out_bytes)
    if vmem_est > _SCOPED_VMEM_DEFAULT:
        compiler_kwargs["vmem_limit_bytes"] = int(
            min(_VMEM_CAPACITY - 8 * 1024 * 1024,
                max(32 * 1024 * 1024, 2 * vmem_est)))

    weight_bytes = 2 * d_pad * h_pad * 2
    weight_passes = num_b if num_k > 1 else 1   # streamed weights re-read per batch tile
    cost = pl.CostEstimate(
        flops=4 * b_pad * d_pad * h_pad,        # two dense matmuls
        transcendentals=0,
        bytes_accessed=(b_pad * d_pad * out_bytes       # x
                        + b_pad * d_pad * out_bytes     # out
                        + weight_passes * weight_bytes  # bf16 weights
                        + (h_pad + d_pad) * 4),         # biases
    )

    call = pl.pallas_call(
        _gan_block_kernel,
        out_shape=jax.ShapeDtypeStruct((b_pad, d_pad), out_dtype),
        grid=grid,
        in_specs=in_specs,
        out_specs=out_specs,
        scratch_shapes=[pltpu.VMEM((tile_b, d_pad), jnp.float32)],
        compiler_params=pltpu.CompilerParams(**compiler_kwargs),
        cost_estimate=cost,
    )

    def fn(x, w1_t, b1, w2_t, b2):
        # Accept PyTorch-style 1-D biases; keep them f32 for the VPU epilogue.
        b1 = jnp.reshape(b1, (1, -1)).astype(jnp.float32)
        b2 = jnp.reshape(b2, (1, -1)).astype(jnp.float32)
        x_p = _pad2(x, b_pad, d_pad)
        w1_p = _pad2(w1_t, d_pad, h_pad).astype(jnp.bfloat16)  # MXU-native operands
        w2_p = _pad2(w2_t, h_pad, d_pad).astype(jnp.bfloat16)
        b1_p = _pad2(b1, 1, h_pad)
        b2_p = _pad2(b2, 1, d_pad)
        out_p = call(x_p, w1_p, b1_p, w2_p, b2_p)
        if b_pad != B or d_pad != D:
            out_p = out_p[:B, :D]
        return out_p

    return jax.jit(fn)


def gan_block(x, w1_t, b1, w2_t, b2):
    """Fused GanBlock forward: relu(x @ w1_t + b1) @ w2_t + b2.

    x: (B, D).  w*_t: (D, D) pre-transposed to (in, out).  b*: (D,) or (1, D).
    """
    B, D = x.shape
    return _build_gan_block(int(B), int(D), jnp.dtype(x.dtype).name)(
        x, w1_t, b1, w2_t, b2)


def init_params(key, block_dims, dtype=jnp.float32):
    """Deterministic init mimicking nn.Linear's uniform(-1/sqrt(fan_in), ...)."""
    k1, k2, k3, k4 = jax.random.split(key, 4)
    bound = 1.0 / jnp.sqrt(block_dims)
    # PyTorch stores weight as (out, in); we keep the transposed (in, out) layout.
    w1_t = jax.random.uniform(k1, (block_dims, block_dims), dtype, -bound, bound)
    b1 = jax.random.uniform(k2, (block_dims,), dtype, -bound, bound)
    w2_t = jax.random.uniform(k3, (block_dims, block_dims), dtype, -bound, bound)
    b2 = jax.random.uniform(k4, (block_dims,), dtype, -bound, bound)
    return w1_t, b1, w2_t, b2


if __name__ == "__main__":
    key = jax.random.PRNGKey(0)
    kx, kp = jax.random.split(key)

    batch = 384        # splits as 2 x 192-row tiles with zero batch padding
    block_dims = 128   # lane-aligned feature dim -> single resident weight chunk

    x = jax.random.normal(kx, (batch, block_dims), dtype=jnp.float32)
    w1_t, b1, w2_t, b2 = init_params(kp, block_dims)

    out = gan_block(x, w1_t, b1, w2_t, b2)
    jax.block_until_ready(out)
    assert out.shape == (batch, block_dims)

    # Second call exercises the compile cache (no rebuild / retrace).
    out2 = jax.block_until_ready(gan_block(x, w1_t, b1, w2_t, b2))
    assert jnp.array_equal(out, out2)

    # Reference with the same bf16-operand / f32-accumulate numerics as the kernel.
    w1_bf = w1_t.astype(jnp.bfloat16)
    w2_bf = w2_t.astype(jnp.bfloat16)
    h_ref = jnp.maximum(
        jnp.dot(x.astype(jnp.bfloat16), w1_bf, preferred_element_type=jnp.float32) + b1,
        0.0)
    ref = jnp.dot(h_ref.astype(jnp.bfloat16), w2_bf,
                  preferred_element_type=jnp.float32) + b2
    assert jnp.allclose(out, ref.astype(out.dtype), atol=1e-3, rtol=1e-3)

    # Sanity vs. full-f32 math (loose tolerance: bf16 MXU operands by design).
    ref_f32 = jnp.maximum(x @ w1_t + b1, 0.0) @ w2_t + b2
    assert jnp.allclose(out, ref_f32, atol=1e-1, rtol=1e-1)

    print("KERNEL_OK")
</pallas_src>

<mosaic_0001>
module attributes {stable_mosaic.version = 11 : i64} {
  func.func @_gan_block_kernel(%arg0: i32, %arg1: i32, %arg2: memref<192x128xf32, #tpu.memory_space<vmem>>, %arg3: memref<128x128xbf16, #tpu.memory_space<vmem>>, %arg4: memref<1x128xf32, #tpu.memory_space<vmem>>, %arg5: memref<128x128xbf16, #tpu.memory_space<vmem>>, %arg6: memref<1x128xf32, #tpu.memory_space<vmem>>, %arg7: memref<192x128xf32, #tpu.memory_space<vmem>>, %arg8: memref<192x128xf32, #tpu.memory_space<vmem>>) attributes {dimension_semantics = [#tpu.dimension_semantics<parallel>, #tpu.dimension_semantics<arbitrary>], iteration_bounds = array<i64: 2, 1>, scalar_prefetch = 0 : i64, scratch_operands = 1 : i64, tpu.core_type = #tpu.core_type<tc>, window_params = [{transform_indices = @transform_0, window_bounds = array<i64: 192, 128>}, {transform_indices = @transform_1, window_bounds = array<i64: 128, 128>}, {transform_indices = @transform_2, window_bounds = array<i64: 1, 128>}, {transform_indices = @transform_3, window_bounds = array<i64: 128, 128>}, {pipeline_mode = #tpu.pipeline_mode<synchronous>, transform_indices = @transform_4, window_bounds = array<i64: 1, 128>}, {transform_indices = @transform_5, window_bounds = array<i64: 192, 128>}]} {
    %c0_i32 = arith.constant 0 : i32
    %0 = arith.cmpi eq, %arg1, %c0_i32 : i32
    %1 = arith.extui %0 : i1 to i32
    %c0_i32_0 = arith.constant 0 : i32
    %2 = arith.cmpi ne, %1, %c0_i32_0 : i32
    scf.if %2 {
      %cst_16 = arith.constant 0.000000e+00 : f32
      %21 = vector.broadcast %cst_16 : f32 to vector<192x128xf32>
      %c0_17 = arith.constant 0 : index
      %c0_18 = arith.constant 0 : index
      %22 = vector.load %arg8[%c0_17, %c0_18] : memref<192x128xf32, #tpu.memory_space<vmem>>, vector<192x128xf32>
      tpu.vector_store %arg8[%c0_17, %c0_18], %21 {strides = array<i32>} : memref<192x128xf32, #tpu.memory_space<vmem>>, vector<192x128xf32>,
    } else {
    }
    %c0 = arith.constant 0 : index
    %c0_1 = arith.constant 0 : index
    %3 = vector.load %arg2[%c0, %c0_1] : memref<192x128xf32, #tpu.memory_space<vmem>>, vector<192x128xf32>
    %4 = arith.truncf %3 : vector<192x128xf32> to vector<192x128xbf16>
    %c0_2 = arith.constant 0 : index
    %c0_3 = arith.constant 0 : index
    %5 = vector.load %arg3[%c0_2, %c0_3] : memref<128x128xbf16, #tpu.memory_space<vmem>>, vector<128x128xbf16>
    %cst = arith.constant dense<0.000000e+00> : vector<192x128xf32>
    %6 = tpu.matmul %4, %5, %cst {dimension_numbers = #tpu.dot_dimension_numbers<[1], [0], [0], [1], [0, 0, 1, 1], [], []>} : vector<192x128xbf16>, vector<128x128xbf16>, vector<192x128xf32> -> vector<192x128xf32>
    %c0_4 = arith.constant 0 : index
    %c0_5 = arith.constant 0 : index
    %7 = vector.load %arg4[%c0_4, %c0_5] : memref<1x128xf32, #tpu.memory_space<vmem>>, vector<1x128xf32>
    %8 = vector.broadcast %7 : vector<1x128xf32> to vector<192x128xf32>
    %9 = arith.addf %6, %8 : vector<192x128xf32>
    %cst_6 = arith.constant 0.000000e+00 : f32
    %10 = vector.broadcast %cst_6 : f32 to vector<192x128xf32>
    %11 = arith.maximumf %9, %10 : vector<192x128xf32>
    %c0_7 = arith.constant 0 : index
    %c0_8 = arith.constant 0 : index
    %12 = vector.load %arg8[%c0_7, %c0_8] : memref<192x128xf32, #tpu.memory_space<vmem>>, vector<192x128xf32>
    %13 = arith.truncf %11 : vector<192x128xf32> to vector<192x128xbf16>
    %c0_9 = arith.constant 0 : index
    %c0_10 = arith.constant 0 : index
    %14 = vector.load %arg5[%c0_9, %c0_10] : memref<128x128xbf16, #tpu.memory_space<vmem>>, vector<128x128xbf16>
    %cst_11 = arith.constant dense<0.000000e+00> : vector<192x128xf32>
    %15 = tpu.matmul %13, %14, %cst_11 {dimension_numbers = #tpu.dot_dimension_numbers<[1], [0], [0], [1], [0, 0, 1, 1], [], []>} : vector<192x128xbf16>, vector<128x128xbf16>, vector<192x128xf32> -> vector<192x128xf32>
    %16 = arith.addf %12, %15 : vector<192x128xf32>
    %c0_12 = arith.constant 0 : index
    %c0_13 = arith.constant 0 : index
    %17 = vector.load %arg8[%c0_12, %c0_13] : memref<192x128xf32, #tpu.memory_space<vmem>>, vector<192x128xf32>
    tpu.vector_store %arg8[%c0_12, %c0_13], %16 {strides = array<i32>} : memref<192x128xf32, #tpu.memory_space<vmem>>, vector<192x128xf32>,
    %c0_i32_14 = arith.constant 0 : i32
    %18 = arith.cmpi eq, %arg1, %c0_i32_14 : i32
    %19 = arith.extui %18 : i1 to i32
    %c0_i32_15 = arith.constant 0 : i32
    %20 = arith.cmpi ne, %19, %c0_i32_15 : i32
    scf.if %20 {
      %c0_16 = arith.constant 0 : index
      %c0_17 = arith.constant 0 : index
      %21 = vector.load %arg8[%c0_16, %c0_17] : memref<192x128xf32, #tpu.memory_space<vmem>>, vector<192x128xf32>
      %c0_18 = arith.constant 0 : index
      %c0_19 = arith.constant 0 : index
      %22 = vector.load %arg6[%c0_18, %c0_19] : memref<1x128xf32, #tpu.memory_space<vmem>>, vector<1x128xf32>
      %23 = vector.broadcast %22 : vector<1x128xf32> to vector<192x128xf32>
      %24 = arith.addf %21, %23 : vector<192x128xf32>
      %c0_20 = arith.constant 0 : index
      %c0_21 = arith.constant 0 : index
      %25 = vector.load %arg7[%c0_20, %c0_21] : memref<192x128xf32, #tpu.memory_space<vmem>>, vector<192x128xf32>
      tpu.vector_store %arg7[%c0_20, %c0_21], %24 {strides = array<i32>} : memref<192x128xf32, #tpu.memory_space<vmem>>, vector<192x128xf32>,
    } else {
    }
    return
  }
  func.func @transform_0(%arg0: i32, %arg1: i32) -> (i32, i32) {
    %c0_i32 = arith.constant 0 : i32
    %c0_i32_0 = arith.constant 0 : i32
    return %arg0, %c0_i32 : i32, i32
  }
  func.func @transform_1(%arg0: i32, %arg1: i32) -> (i32, i32) {
    %c0_i32 = arith.constant 0 : i32
    %c0_i32_0 = arith.constant 0 : i32
    return %c0_i32, %arg1 : i32, i32
  }
  func.func @transform_2(%arg0: i32, %arg1: i32) -> (i32, i32) {
    %c0_i32 = arith.constant 0 : i32
    %c0_i32_0 = arith.constant 0 : i32
    return %c0_i32, %arg1 : i32, i32
  }
  func.func @transform_3(%arg0: i32, %arg1: i32) -> (i32, i32) {
    %c0_i32 = arith.constant 0 : i32
    %c0_i32_0 = arith.constant 0 : i32
    return %arg1, %c0_i32 : i32, i32
  }
  func.func @transform_4(%arg0: i32, %arg1: i32) -> (i32, i32) {
    %c0_i32 = arith.constant 0 : i32
    %c0_i32_0 = arith.constant 0 : i32
    %c0_i32_1 = arith.constant 0 : i32
    return %c0_i32, %c0_i32_0 : i32, i32
  }
  func.func @transform_5(%arg0: i32, %arg1: i32) -> (i32, i32) {
    %c0_i32 = arith.constant 0 : i32
    %c0_i32_0 = arith.constant 0 : i32
    return %arg0, %c0_i32 : i32, i32
  }
}

</mosaic_0001>

<bundles_post_ra>
// kernel: fn.1
= control target key start
LH: loop header
LB: loop body
LE: loop exit
PB: predicated region body
PF: predicated region fallthrough
CT: control target
= control target key end

     0   :  { %10 = vsyncpa [#allocation4], 0  ;;  %s1680_s0 = inlined_call_operand.vmem [shape: f32[384,128], index: 0, kind: input, shape index: {}]   ;;  %s1681_s1 = inlined_call_operand.vmem [shape: bf16[128,128], index: 1, kind: input, shape index: {}]   ;;  %s1682_s2 = inlined_call_operand.vmem [shape: f32[1,128], index: 2, kind: input, shape index: {}]   ;;  %s1683_s3 = inlined_call_operand.vmem [shape: bf16[128,128], index: 3, kind: input, shape index: {}]   ;;  %s1684_s4 = inlined_call_operand.vmem [shape: f32[1,128], index: 4, kind: input, shape index: {}]   ;;  %s1685_s5 = inlined_call_operand.hbm [shape: f32[384,128], index: 5, kind: output, shape index: {}]  }
   0x1   :  { %12 = vsyncpa [#allocation4 + $0x1], 0  ;;  %s1403_s18 = smov 0   ;;  %s1405_s19 = smov 0  }
   0x2   :  { %s1407_s20 = smov 0   ;;  %s1409_s21 = smov 0  }
   0x3   :  { %s1411_s22 = smov 0   ;;  %s1413_s23 = smov 0  }
   0x4 LB: > { %s1065_s24 = sadd.s32 4294967295, %s1368_s23   ;;  %s1066_s25 = sadd.s32 4294967294, %s1368_s23   ;;  %s1368_s23 = sphi %s1413_s23, %s18_s23   ;;  %s1364_s22 = sphi %s1411_s22, %s1692_s22   ;;  %s1360_s21 = sphi %s1409_s21, %s1691_s21   ;;  %s1356_s20 = sphi %s1407_s20, %s1690_s20   ;;  %s1352_s19 = sphi %s1405_s19, %s1689_s19   ;;  %s1348_s18 = sphi %s1403_s18, %s1688_s18  }
   0x5   : > { %s30_s26 = sadd.s32 1, %s1364_s22  ;;  %s162_s27 = sadd.s32 1, %s1356_s20 }
   0x6   : > { %p32_p0 = scmp.ge.s32.totalorder %s30_s26, 2  ;;  %p172_p1 = scmp.ne.s32.totalorder %s1356_s20, %s1352_s19 }
   0x7   : > { %p173_p2 = scmp.eq.s32.totalorder %s1065_s24, 1  ;;  %p178_p3 = scmp.ne.s32.totalorder %s1352_s19, %s1348_s18 }
   0x8   : > { %s1694_s26 = smov (%p32_p0, %s30_s26), 0  ;;  %p179_p5 = scmp.eq.s32.totalorder %s1066_s25, 1 }
   0x9   : > { %p1443_p4 = por %p173_p2, %p172_p1  ;;  %s159_s29 = ssub.s32 %s1364_s22, %s1694_s26 }
   0xa   : > { %p1072_p6 = scmp.ge.s32.totalorder %s1368_s23, 1  ;;  %p160_p7 = scmp.eq.s32.totalorder %s159_s29, 0 }
   0xb   : > { %p1450_p8 = por %p179_p5, %p178_p3  ;;  %p231_p9 = scmp.lt.s32.totalorder %s1368_s23, 3 }
   0xc   : > { %s1456_s6 = scalar_select %p160_p7, %s1356_s20, %s162_s27  }
   0xd   : > { %p232_p10 = pnand %p1072_p6, %p231_p9 }
   0xe   : > { %v1274_v0 = vld [vmem:[%s1681_s1] sm:$0xff] (!%p232_p10)   ;;  %s271_s9 = smul.u32 (!%p232_p10), 24, %s1360_s21  ;;  %v1275_v1 = vld [vmem:[%s1681_s1 + $0x8] sm:$0xff] (!%p232_p10)   ;;  %v1276_v2 = vld [vmem:[%s1681_s1 + $0x10] sm:$0xff] (!%p232_p10)   ;;  %s1370_s13 = smov (!%p232_p10), [#allocation3]  }
   0xf   : > { %235 = sbr.rel (%p232_p10) target bundleno = 541 (0x21d), region = 40  ;;  %1136 = vmatprep.subr.bf16.mxu0 (!%p232_p10), %v1274_v0  ;;  %v1277_v3 = vld [vmem:[%s1681_s1 + $0x18] sm:$0xff] (!%p232_p10)   ;;  %v1278_v7 = vld [vmem:[%s1681_s1 + $0x20] sm:$0xff] (!%p232_p10)   ;;  %v1279_v8 = vld [vmem:[%s1681_s1 + $0x28] sm:$0xff] (!%p232_p10)  }
  0x10   : > { %p272_p11 = scmp.lt.s32.totalorder (!%p232_p10), %s271_s9, 47  ;;  %1137 = vmatpush3.bf16.msra.mxu0 (!%p232_p10), %v1274_v0  ;;  %v1282_v9 = vld [vmem:[%s1683_s3] sm:$0xff] (!%p232_p10)   ;;  %v1283_v10 = vld [vmem:[%s1683_s3 + $0x8] sm:$0xff] (!%p232_p10)   ;;  %v1280_v11 = vld [vmem:[%s1681_s1 + $0x30] sm:$0xff] (!%p232_p10)   ;;  %s1095_s7 = smul.u32 (!%p232_p10), 3072, %s1360_s21 }
  0x11   : > { %1138 = vmatprep.subr.bf16.mxu0 (!%p232_p10), %v1275_v1  ;;  %1176 = vmatprep.subr.bf16.mxu1 (!%p232_p10), %v1282_v9  ;;  %v1284_v12 = vld [vmem:[%s1683_s3 + $0x10] sm:$0xff] (!%p232_p10)   ;;  %v1281_v13 = vld [vmem:[%s1681_s1 + $0x38] sm:$0xff] (!%p232_p10)   ;;  %v1286_v19 = vld [vmem:[%s1683_s3 + $0x20] sm:$0xff] (!%p232_p10)  }
  0x12   : > { %1177 = vmatpush3.bf16.msra.mxu1 (!%p232_p10), %v1282_v9  ;;  %v1285_v14 = vld [vmem:[%s1683_s3 + $0x18] sm:$0xff] (!%p232_p10)   ;;  %v1287_v22 = vld [vmem:[%s1683_s3 + $0x28] sm:$0xff] (!%p232_p10)   ;;  %v1288_v50 = vld [vmem:[%s1683_s3 + $0x30] sm:$0xff] (!%p232_p10)   ;;  %s1624_s11 = scalar_lea.hbm (!%p232_p10), %s1685_s5, %s1095_s7 }
  0x13   : > { %1178 = vmatprep.subr.bf16.mxu1 (!%p232_p10), %v1283_v10  ;;  %v1289_v51 = vld [vmem:[%s1683_s3 + $0x38] sm:$0xff] (!%p232_p10)   ;;  %v1539_v52 = vld [vmem:[%s1682_s2] ss:$0 sm:$0xff] (!%p232_p10) }
  0x14   : > { %1139 = vmatpush3.bf16.msra.mxu0 (!%p232_p10), %v1275_v1 }
  0x15   : > { %1140 = vmatprep.subr.bf16.mxu0 (!%p232_p10), %v1276_v2 }
  0x16   : > { %s1696_s9 = smov (!%p272_p11, %s271_s9), 47  ;;  %1179 = vmatpush3.bf16.msra.mxu1 %v1283_v10 }
  0x17   : > { %s1073_s14 = sshll.u32 %s1696_s9, 3  ;;  %1180 = vmatprep.subr.bf16.mxu1 %v1284_v12 }
  0x18   : > { %s1471_s17 = scalar_lea.vmem %s1680_s0, %s1073_s14  ;;  %1141 = vmatpush3.bf16.msra.mxu0 %v1276_v2  ;;  %s1294_s14 = sshll.u32 %s1370_s13, 4  ;;  %s1295_s14 = int_to_ptr.vmem [resolvable:$false] %s1294_s14 }
  0x19   : > { %v320_v4 = vld [vmem:[%s1471_s17] sm:$0xff]  ;;  %v321_v5 = vld [vmem:[%s1471_s17 + $0x8] sm:$0xff]  ;;  %1142 = vmatprep.subr.bf16.mxu0 %v1277_v3  ;;  %v322_v15 = vld [vmem:[%s1471_s17 + $0x10] sm:$0xff]  ;;  %s1296_s15 = scalar_lea.vmem %s1295_s14, 6144 }
  0x1a   : > { %v344_v6 = vpack.c.bf16 %v321_v5, %v320_v4  ;;  %v323_v16 = vld [vmem:[%s1471_s17 + $0x18] sm:$0xff]  ;;  %1181 = vmatpush3.bf16.msra.mxu1 %v1284_v12  ;;  %v324_v17 = vld [vmem:[%s1471_s17 + $0x20] sm:$0xff]  ;;  %v325_v18 = vld [vmem:[%s1471_s17 + $0x28] sm:$0xff] }
  0x1b   : > { %1182 = vmatprep.subr.bf16.mxu1 %v1285_v14  ;;  %v345_v20 = vpack.c.bf16 %v323_v16, %v322_v15  ;;  %v346_v21 = vpack.c.bf16 %v325_v18, %v324_v17  ;;  %v326_v23 = vld [vmem:[%s1471_s17 + $0x30] sm:$0xff]  ;;  %v327_v24 = vld [vmem:[%s1471_s17 + $0x38] sm:$0xff]  ;;  %v328_v25 = vld [vmem:[%s1471_s17 + $0x40] sm:$0xff] }
  0x1c   : > { %1152 = vmatprep.mubr.bf16.mxu0 %v344_v6  ;;  %1143 = vmatpush3.bf16.msra.mxu0 %v1277_v3  ;;  %v329_v26 = vld [vmem:[%s1471_s17 + $0x48] sm:$0xff]  ;;  %v347_v27 = vpack.c.bf16 %v327_v24, %v326_v23  ;;  %v330_v29 = vld [vmem:[%s1471_s17 + $0x50] sm:$0xff]  ;;  %v331_v30 = vld [vmem:[%s1471_s17 + $0x58] sm:$0xff] }
  0x1d   : > { %1144 = vmatprep.subr.bf16.mxu0 %v1278_v7  ;;  %v348_v28 = vpack.c.bf16 %v329_v26, %v328_v25  ;;  %v332_v31 = vld [vmem:[%s1471_s17 + $0x60] sm:$0xff]  ;;  %v333_v32 = vld [vmem:[%s1471_s17 + $0x68] sm:$0xff]  ;;  %v349_v33 = vpack.c.bf16 %v331_v30, %v330_v29  ;;  %v334_v35 = vld [vmem:[%s1471_s17 + $0x70] sm:$0xff] }
  0x1e   : > { %1183 = vmatpush3.bf16.msra.mxu1 %v1285_v14  ;;  %v350_v34 = vpack.c.bf16 %v333_v32, %v332_v31  ;;  %v335_v36 = vld [vmem:[%s1471_s17 + $0x78] sm:$0xff]  ;;  %v336_v37 = vld [vmem:[%s1471_s17 + $0x80] sm:$0xff]  ;;  %v337_v38 = vld [vmem:[%s1471_s17 + $0x88] sm:$0xff] }
  0x1f   : > { %1184 = vmatprep.subr.bf16.mxu1 %v1286_v19  ;;  %v351_v39 = vpack.c.bf16 %v335_v36, %v334_v35  ;;  %v352_v40 = vpack.c.bf16 %v337_v38, %v336_v37  ;;  %v338_v41 = vld [vmem:[%s1471_s17 + $0x90] sm:$0xff]  ;;  %v339_v42 = vld [vmem:[%s1471_s17 + $0x98] sm:$0xff]  ;;  %v340_v43 = vld [vmem:[%s1471_s17 + $0xa0] sm:$0xff] }
  0x20   : > { %1145 = vmatpush3.bf16.msra.mxu0 %v1278_v7  ;;  %v341_v44 = vld [vmem:[%s1471_s17 + $0xa8] sm:$0xff]  ;;  %v353_v45 = vpack.c.bf16 %v339_v42, %v338_v41  ;;  %v342_v47 = vld [vmem:[%s1471_s17 + $0xb0] sm:$0xff]  ;;  %v343_v48 = vld [vmem:[%s1471_s17 + $0xb8] sm:$0xff]  ;;  %s268_s17 = sand.u32 1, %s1352_s19  }
  0x21   : > { %1146 = vmatprep.subr.bf16.mxu0 %v1279_v8  ;;  %v354_v46 = vpack.c.bf16 %v341_v44, %v340_v43  ;;  %v355_v49 = vpack.c.bf16 %v343_v48, %v342_v47  ;;  %s1216_s24 = smul.u32 192, %s268_s17  ;;  %s1634_s21 = scalar_lea.sflag [#allocation4], %s268_s17 }
  0x22   : > { %1185 = vmatpush3.bf16.msra.mxu1 %v1286_v19 }
  0x23   : > { %1186 = vmatprep.subr.bf16.mxu1 %v1287_v22  ;;  %s1575_s29 = scalar_lea.vmem [#allocation3], %s1216_s24 }
  0x24   : > { %1147 = vmatpush3.bf16.msra.mxu0 %v1279_v8  ;;  %s953_s8 = sshll.u32 %s1575_s29, 4  ;;  %s1626_s8 = int_to_ptr.vmem [resolvable:$true] %s953_s8 }
  0x25   : > { %1148 = vmatprep.subr.bf16.mxu0 %v1280_v11  ;;  %s1290_s12 = scalar_lea.vmem %s1626_s8, 3072  ;;  %p1297_p1 = scmp.lt.s32.totalorder %s1626_s8, %s1295_s14 }
  0x26   : > { %1187 = vmatpush3.bf16.msra.mxu1 %v1287_v22  ;;  %p1291_p12 = scmp.ne.s32.totalorder %s1626_s8, %s1290_s12  ;;  %p1298_p2 = scmp.lt.s32.totalorder %s1296_s15, %s1290_s12 }
  0x27   : > { %1188 = vmatprep.subr.bf16.mxu1 %v1288_v50 }
  0x28   : > { %1149 = vmatpush3.bf16.msra.mxu0 %v1280_v11  ;;  %p1292_p13 = pnand %p1291_p12, %p1443_p4  ;;  %p1299_p3 = por %p1298_p2, %p1297_p1 }
  0x29   : > { %1150 = vmatprep.subr.bf16.mxu0 %v1281_v13 }
  0x2a   : > { %1189 = vmatpush3.bf16.msra.mxu1 %v1288_v50  ;;  %p1293_p0 = pneg %p1292_p13 }
  0x2b   : > { %1190 = vmatprep.subr.bf16.mxu1 %v1289_v51 }
  0x2c   : > { %1151 = vmatpush3.bf16.msra.mxu0 %v1281_v13  ;;  %p1300_p5 = pnand %p1299_p3, %p1293_p0 }
  0x2e   : > { %1191 = vmatpush3.bf16.msra.mxu1 %v1289_v51 }
  0x2f   : > { %1153 = vmatmul.mubr.bf16.vlgmr.msra.gmra.mrb[0].mxu0 %v345_v20 }
  0x30   : > { %1156 = vmatprep.mubr.bf16.mxu0 %v346_v21 }
  0x37   : > { %1157 = vmatmul.mubr.bf16.gmra.mrb[4].mxu0 %v347_v27 }
  0x38   : > { %1160 = vmatprep.mubr.bf16.mxu0 %v348_v28 }
  0x3f   : > { %1161 = vmatmul.mubr.bf16.gmra.mrb[8].mxu0 %v349_v33 }
  0x40   : > { %1164 = vmatprep.mubr.bf16.mxu0 %v350_v34 }
  0x47   : > { %1165 = vmatmul.mubr.bf16.gmra.mrb[12].mxu0 %v351_v39 }
  0x48   : > { %1168 = vmatprep.mubr.bf16.mxu0 %v352_v40 }
  0x4f   : > { %1169 = vmatmul.mubr.bf16.gmra.mrb[16].mxu0 %v353_v45 }
  0x50   : > { %1172 = vmatprep.mubr.bf16.mxu0 %v354_v46 }
  0x57   : > { %1173 = vmatmul.mubr.bf16.gmra.mrb[20].mxu0 %v355_v49 }
 0x102   : > { %v1154_v53 = vpop.f32.mrb[0].mxu0 }
 0x103   : > { %v470_v54 = vadd.f32 %v1154_v53, %v1539_v52  ;;  %v461_v55 = vpop.f32.mrb[1].mxu0 }
 0x104   : > { %v462_v56 = vadd.f32 %v1539_v52, %v461_v55  ;;  %v1155_v57 = vpop.f32.mrb[2].mxu0 }
 0x105   : > { %v473_v58 = vadd.f32 %v1155_v57, %v1539_v52  ;;  %v464_v59 = vpop.f32.mrb[3].mxu0  ;;  %v558_v61 = vmax.f32 %v470_v54, 0.0 }
 0x106   : > { %v465_v60 = vadd.f32 %v1539_v52, %v464_v59  ;;  %v556_v63 = vmax.f32 %v462_v56, 0.0 }
 0x107   : > { %v559_v62 = vmax.f32 %v473_v58, 0.0 }
 0x108   : > { %v557_v0 = vmax.f32 %v465_v60, 0.0 }
 0x109   : > { %v605_v1 = vpack.c.bf16 %v559_v62, %v558_v61 }
 0x10a   : > { %v1158_v2 = vpop.f32.mrb[4].mxu0  ;;  %v604_v3 = vpack.c.bf16 %v557_v0, %v556_v63 }
 0x10b   : > { %v486_v4 = vadd.f32 %v1158_v2, %v1539_v52  ;;  %v477_v5 = vpop.f32.mrb[5].mxu0 }
 0x10c   : > { %v478_v6 = vadd.f32 %v1539_v52, %v477_v5  ;;  %v1159_v7 = vpop.f32.mrb[6].mxu0  ;;  %1192 = vmatprep.mubr.bf16.mxu1 %v604_v3 }
 0x10d   : > { %v489_v8 = vadd.f32 %v1159_v7, %v1539_v52  ;;  %v480_v9 = vpop.f32.mrb[7].mxu0  ;;  %1193 = vmatmul.mubr.bf16.vlgmr.msra.gmra.mrb[0].mxu1 %v605_v1  ;;  %v562_v11 = vmax.f32 %v486_v4, 0.0 }
 0x10e   : > { %v481_v10 = vadd.f32 %v1539_v52, %v480_v9  ;;  %v560_v13 = vmax.f32 %v478_v6, 0.0 }
 0x10f   : > { %v563_v12 = vmax.f32 %v489_v8, 0.0 }
 0x110   : > { %v561_v14 = vmax.f32 %v481_v10, 0.0  ;;  %v1571_v10 = vld [vmem:[%s1684_s4] ss:$0 sm:$0xff] }
 0x111   : > { %v607_v15 = vpack.c.bf16 %v563_v12, %v562_v11 }
 0x112   : > { %v606_v16 = vpack.c.bf16 %v561_v14, %v560_v13  ;;  %v1162_v17 = vpop.f32.mrb[8].mxu0 }
 0x113   : > { %v502_v18 = vadd.f32 %v1162_v17, %v1539_v52  ;;  %v493_v19 = vpop.f32.mrb[9].mxu0 }
 0x114   : > { %v494_v20 = vadd.f32 %v1539_v52, %v493_v19  ;;  %v1163_v21 = vpop.f32.mrb[10].mxu0  ;;  %1196 = vmatprep.mubr.bf16.mxu1 %v606_v16 }
 0x115   : > { %v505_v22 = vadd.f32 %v1163_v21, %v1539_v52  ;;  %v496_v23 = vpop.f32.mrb[11].mxu0  ;;  %1197 = vmatmul.mubr.bf16.gmra.mrb[4].mxu1 %v607_v15  ;;  %v566_v25 = vmax.f32 %v502_v18, 0.0 }
 0x116   : > { %v497_v24 = vadd.f32 %v1539_v52, %v496_v23  ;;  %v564_v27 = vmax.f32 %v494_v20, 0.0 }
 0x117   : > { %v567_v26 = vmax.f32 %v505_v22, 0.0 }
 0x118   : > { %v565_v28 = vmax.f32 %v497_v24, 0.0 }
 0x119   : > { %v609_v29 = vpack.c.bf16 %v567_v26, %v566_v25 }
 0x11a   : > { %v608_v30 = vpack.c.bf16 %v565_v28, %v564_v27  ;;  %v1166_v31 = vpop.f32.mrb[12].mxu0 }
 0x11b   : > { %v518_v32 = vadd.f32 %v1166_v31, %v1539_v52  ;;  %v509_v33 = vpop.f32.mrb[13].mxu0 }
 0x11c   : > { %v510_v34 = vadd.f32 %v1539_v52, %v509_v33  ;;  %v1167_v35 = vpop.f32.mrb[14].mxu0  ;;  %1200 = vmatprep.mubr.bf16.mxu1 %v608_v30 }
 0x11d   : > { %v521_v36 = vadd.f32 %v1167_v35, %v1539_v52  ;;  %v512_v37 = vpop.f32.mrb[15].mxu0  ;;  %1201 = vmatmul.mubr.bf16.gmra.mrb[8].mxu1 %v609_v29  ;;  %v570_v39 = vmax.f32 %v518_v32, 0.0 }
 0x11e   : > { %v513_v38 = vadd.f32 %v1539_v52, %v512_v37  ;;  %v568_v41 = vmax.f32 %v510_v34, 0.0 }
 0x11f   : > { %v571_v40 = vmax.f32 %v521_v36, 0.0 }
 0x120   : > { %v569_v42 = vmax.f32 %v513_v38, 0.0 }
 0x121   : > { %v611_v43 = vpack.c.bf16 %v571_v40, %v570_v39 }
 0x122   : > { %v610_v44 = vpack.c.bf16 %v569_v42, %v568_v41  ;;  %v1170_v45 = vpop.f32.mrb[16].mxu0 }
 0x123   : > { %v534_v46 = vadd.f32 %v1170_v45, %v1539_v52  ;;  %v525_v47 = vpop.f32.mrb[17].mxu0 }
 0x124   : > { %v526_v48 = vadd.f32 %v1539_v52, %v525_v47  ;;  %v1171_v49 = vpop.f32.mrb[18].mxu0  ;;  %1204 = vmatprep.mubr.bf16.mxu1 %v610_v44 }
 0x125   : > { %v537_v50 = vadd.f32 %v1171_v49, %v1539_v52  ;;  %v528_v51 = vpop.f32.mrb[19].mxu0  ;;  %1205 = vmatmul.mubr.bf16.gmra.mrb[12].mxu1 %v611_v43  ;;  %v574_v54 = vmax.f32 %v534_v46, 0.0 }
 0x126   : > { %v529_v53 = vadd.f32 %v1539_v52, %v528_v51  ;;  %v572_v56 = vmax.f32 %v526_v48, 0.0 }
 0x127   : > { %v575_v55 = vmax.f32 %v537_v50, 0.0 }
 0x128   : > { %v573_v57 = vmax.f32 %v529_v53, 0.0 }
 0x129   : > { %v613_v58 = vpack.c.bf16 %v575_v55, %v574_v54 }
 0x12a   : > { %v612_v59 = vpack.c.bf16 %v573_v57, %v572_v56  ;;  %v1174_v60 = vpop.f32.mrb[20].mxu0 }
 0x12b   : > { %v550_v61 = vadd.f32 %v1174_v60, %v1539_v52  ;;  %v541_v62 = vpop.f32.mrb[21].mxu0 }
 0x12c   : > { %v542_v63 = vadd.f32 %v1539_v52, %v541_v62  ;;  %v1175_v0 = vpop.f32.mrb[22].mxu0  ;;  %1208 = vmatprep.mubr.bf16.mxu1 %v612_v59 }
 0x12d   : > { %v553_v1 = vadd.f32 %v1175_v0, %v1539_v52  ;;  %v544_v2 = vpop.f32.mrb[23].mxu0  ;;  %1209 = vmatmul.mubr.bf16.gmra.mrb[16].mxu1 %v613_v58  ;;  %v578_v4 = vmax.f32 %v550_v61, 0.0 }
 0x12e   : > { %v545_v3 = vadd.f32 %v1539_v52, %v544_v2  ;;  %v576_v6 = vmax.f32 %v542_v63, 0.0 }
 0x12f   : > { %v579_v5 = vmax.f32 %v553_v1, 0.0 }
 0x130   : > { %v577_v7 = vmax.f32 %v545_v3, 0.0 }
 0x131   : > { %v615_v8 = vpack.c.bf16 %v579_v5, %v578_v4 }
 0x132   : > { %v614_v9 = vpack.c.bf16 %v577_v7, %v576_v6 }
 0x134   : > { %1212 = vmatprep.mubr.bf16.mxu1 %v614_v9 }
 0x135   : > { %1213 = vmatmul.mubr.bf16.gmra.mrb[20].mxu1 %v615_v8 }
 0x1e0   : > { %v1194_v11 = vpop.f32.mrb[0].mxu1 }
 0x1e1   : > { %v893_v12 = vadd.f32 %v1194_v11, %v1571_v10  ;;  %v714_v52 = vpop.f32.mrb[1].mxu1 }
 0x1e2   : > { %v891_v13 = vadd.f32 %v1571_v10, %v714_v52  ;;  %v1195_v14 = vpop.f32.mrb[2].mxu1 }
 0x1e3   : > { %917 = vst [vmem:[%s1575_s29 + $0x10] sm:$0xff] %v893_v12  ;;  %v894_v15 = vadd.f32 %v1195_v14, %v1571_v10  ;;  %v717_v16 = vpop.f32.mrb[3].mxu1 }
 0x1e4   : > { %915 = vst [vmem:[%s1575_s29] sm:$0xff] %v891_v13  ;;  %v892_v17 = vadd.f32 %v1571_v10, %v717_v16 }
 0x1e5   : > { %918 = vst [vmem:[%s1575_s29 + $0x18] sm:$0xff] %v894_v15 }
 0x1e6   : > { %916 = vst [vmem:[%s1575_s29 + $0x8] sm:$0xff] %v892_v17 }
 0x1e8   : > { %v1198_v18 = vpop.f32.mrb[4].mxu1 }
 0x1e9   : > { %v897_v19 = vadd.f32 %v1198_v18, %v1571_v10  ;;  %v730_v20 = vpop.f32.mrb[5].mxu1 }
 0x1ea   : > { %v895_v21 = vadd.f32 %v1571_v10, %v730_v20  ;;  %v1199_v22 = vpop.f32.mrb[6].mxu1 }
 0x1eb   : > { %921 = vst [vmem:[%s1575_s29 + $0x30] sm:$0xff] %v897_v19  ;;  %v898_v23 = vadd.f32 %v1199_v22, %v1571_v10  ;;  %v733_v24 = vpop.f32.mrb[7].mxu1 }
 0x1ec   : > { %919 = vst [vmem:[%s1575_s29 + $0x20] sm:$0xff] %v895_v21  ;;  %v896_v25 = vadd.f32 %v1571_v10, %v733_v24 }
 0x1ed   : > { %922 = vst [vmem:[%s1575_s29 + $0x38] sm:$0xff] %v898_v23 }
 0x1ee   : > { %920 = vst [vmem:[%s1575_s29 + $0x28] sm:$0xff] %v896_v25 }
 0x1f0   : > { %v1202_v26 = vpop.f32.mrb[8].mxu1 }
 0x1f1   : > { %v901_v27 = vadd.f32 %v1202_v26, %v1571_v10  ;;  %v746_v28 = vpop.f32.mrb[9].mxu1 }
 0x1f2   : > { %v899_v29 = vadd.f32 %v1571_v10, %v746_v28  ;;  %v1203_v30 = vpop.f32.mrb[10].mxu1 }
 0x1f3   : > { %925 = vst [vmem:[%s1575_s29 + $0x50] sm:$0xff] %v901_v27  ;;  %v902_v31 = vadd.f32 %v1203_v30, %v1571_v10  ;;  %v749_v32 = vpop.f32.mrb[11].mxu1 }
 0x1f4   : > { %923 = vst [vmem:[%s1575_s29 + $0x40] sm:$0xff] %v899_v29  ;;  %v900_v33 = vadd.f32 %v1571_v10, %v749_v32 }
 0x1f5   : > { %926 = vst [vmem:[%s1575_s29 + $0x58] sm:$0xff] %v902_v31 }
 0x1f6   : > { %924 = vst [vmem:[%s1575_s29 + $0x48] sm:$0xff] %v900_v33 }
 0x1f8   : > { %v1206_v34 = vpop.f32.mrb[12].mxu1 }
 0x1f9   : > { %v905_v35 = vadd.f32 %v1206_v34, %v1571_v10  ;;  %v762_v36 = vpop.f32.mrb[13].mxu1 }
 0x1fa   : > { %v903_v37 = vadd.f32 %v1571_v10, %v762_v36  ;;  %v1207_v38 = vpop.f32.mrb[14].mxu1 }
 0x1fb   : > { %929 = vst [vmem:[%s1575_s29 + $0x70] sm:$0xff] %v905_v35  ;;  %v906_v39 = vadd.f32 %v1207_v38, %v1571_v10  ;;  %v765_v40 = vpop.f32.mrb[15].mxu1 }
 0x1fc   : > { %927 = vst [vmem:[%s1575_s29 + $0x60] sm:$0xff] %v903_v37  ;;  %v904_v41 = vadd.f32 %v1571_v10, %v765_v40 }
 0x1fd   : > { %930 = vst [vmem:[%s1575_s29 + $0x78] sm:$0xff] %v906_v39 }
 0x1fe   : > { %928 = vst [vmem:[%s1575_s29 + $0x68] sm:$0xff] %v904_v41 }
 0x200   : > { %v1210_v42 = vpop.f32.mrb[16].mxu1 }
 0x201   : > { %v909_v43 = vadd.f32 %v1210_v42, %v1571_v10  ;;  %v778_v44 = vpop.f32.mrb[17].mxu1 }
 0x202   : > { %v907_v45 = vadd.f32 %v1571_v10, %v778_v44  ;;  %v1211_v46 = vpop.f32.mrb[18].mxu1 }
 0x203   : > { %933 = vst [vmem:[%s1575_s29 + $0x90] sm:$0xff] %v909_v43  ;;  %v910_v47 = vadd.f32 %v1211_v46, %v1571_v10  ;;  %v781_v48 = vpop.f32.mrb[19].mxu1 }
 0x204   : > { %931 = vst [vmem:[%s1575_s29 + $0x80] sm:$0xff] %v907_v45  ;;  %v908_v49 = vadd.f32 %v1571_v10, %v781_v48 }
 0x205   : > { %934 = vst [vmem:[%s1575_s29 + $0x98] sm:$0xff] %v910_v47 }
 0x206   : > { %932 = vst [vmem:[%s1575_s29 + $0x88] sm:$0xff] %v908_v49 }
 0x208   : > { %v1214_v50 = vpop.f32.mrb[20].mxu1 }
 0x209   : > { %v913_v51 = vadd.f32 %v1214_v50, %v1571_v10  ;;  %v794_v53 = vpop.f32.mrb[21].mxu1 }
 0x20a   : > { %v911_v54 = vadd.f32 %v1571_v10, %v794_v53  ;;  %v1215_v55 = vpop.f32.mrb[22].mxu1 }
 0x20b   : > { %937 = vst [vmem:[%s1575_s29 + $0xb0] sm:$0xff] %v913_v51  ;;  %v914_v56 = vadd.f32 %v1215_v55, %v1571_v10  ;;  %v797_v57 = vpop.f32.mrb[23].mxu1 }
 0x20c   : > { %935 = vst [vmem:[%s1575_s29 + $0xa0] sm:$0xff] %v911_v54  ;;  %v912_v58 = vadd.f32 %v1571_v10, %v797_v57 }
 0x20d   : > { %938 = vst [vmem:[%s1575_s29 + $0xb8] sm:$0xff] %v914_v56 }
 0x20e   : > { %936 = vst [vmem:[%s1575_s29 + $0xa8] sm:$0xff] %v912_v58 }
 0x20f   : > { %1303 = shalt.err (!%p1300_p5)
}
 0x210   : > { %s1304_s16 = scalar_lea.hbm %s1624_s11, 3072  ;;  %s1308_s25 = scalar_lea.hbm %s1685_s5, 6144 }
 0x211   : > { %p1305_p6 = scmp.ne.s32.totalorder %s1624_s11, %s1304_s16  ;;  %p1309_p10 = scmp.lt.u32.totalorder %s1624_s11, %s1685_s5 }
 0x212   : > { %p1310_p11 = scmp.lt.u32.totalorder %s1308_s25, %s1304_s16  ;;  %p1312_p13 = scmp.lt.u32.totalorder %s1304_s16, %s1624_s11 }
 0x213   : > { %p1306_p7 = pnand %p1305_p6, %p1443_p4 }
 0x214   : > { %p1311_p12 = por %p1310_p11, %p1309_p10 }
 0x215   : > { %p1307_p9 = pneg %p1306_p7 }
 0x216   : > { %p1313_p0 = por %p1312_p13, %p1311_p12 }
 0x218   : > { %p1314_p1 = pnand %p1313_p0, %p1307_p9 }
 0x21a   : > { %1317 = shalt.err (!%p1314_p1)
}
 0x21b   : > { %s1371_s7 = smov 128   ;;  %s1372_s9 = smov 8  }
 0x21c   : > { %1217 = dma.vmem_to_hbm [thread:$0]  (%p1443_p4), %s1626_s8, 3072, %s1624_s11, %s1634_s21, %s1371_s7, %s1371_s7, %s1372_s9  }
 0x21d PF: > { %p1223_p2 = scmp.ge.s32.totalorder %s1368_s23, 2  ;;  %s968_s10 = sand.u32 1, %s1348_s18  }
 0x21e   : > { %s969_s12 = scalar_lea.sflag [#allocation4], %s968_s10 }
 0x21f   : > { %p1220_p3 = pnand %p1223_p2, %p1450_p8 }
 0x221   : > { %1343 = dma.done.wait (!%p1220_p3), %s969_s12, 3072  }
 0x222   : > { %1345 = vsyncadd (!%p1220_p3), %s969_s12, 4294964224  ;;  %s18_s23 = sadd.s32 1, %s1368_s23   ;;  %s1688_s18 = smov %s1352_s19 }
 0x223   : > { %p15_p5 = scmp.ge.s32.totalorder %s18_s23, 4   ;;  %s1689_s19 = smov %s1356_s20 }
 0x224   : > { %s1690_s20 = smov %s1456_s6  ;;  %s1691_s21 = smov %s1364_s22 }
 0x225   : > { %s1692_s22 = smov %s1694_s26  ;;  %17 = sbr.rel (!%p15_p5) target bundleno = 4 (0x4), region = 92 }
 0x22c   :  { %974 = vsyncpa [#allocation4], 1 }
 0x22d   :  { %976 = vsyncpa [#allocation4 + $0x1], 1 }

</bundles_post_ra>
